<compile_context>
chip_gen: v6e
topology: v6e:2x2x1
jax: 0.10.0
libtpu: 0.0.40
codegen_flags: <defaults>
</compile_context>

<pallas_src>
import functools

import jax
import jax.numpy as jnp
from jax.experimental import pallas as pl
from jax.experimental.pallas import tpu as pltpu

BN_EPS = 1e-5
NEG_SLOPE = 0.1


def _leaky_relu(x, slope):
    return jnp.where(x >= 0, x, slope * x)


def _round_up(x, m):
    return (x + m - 1) // m * m


def mlp_kernel(x_ref, w1_ref, b1_ref, w2_ref, b2_ref, w3t_ref, b3t_ref, out_ref):
    x = x_ref[...]                                                    # f32 [bm, F]

    # ---- Layer 1: Linear(F, 64) [+ folded BN] + LeakyReLU(0.1) ----
    h = jnp.dot(x, w1_ref[...], preferred_element_type=jnp.float32) + b1_ref[...]
    h = _leaky_relu(h, NEG_SLOPE)
    # Dropout(0.35): identity in eval mode.

    # ---- Layer 2: Linear(64, 32) [+ folded BN] + LeakyReLU(0.1) ----
    h = jnp.dot(h, w2_ref[...], preferred_element_type=jnp.float32) + b2_ref[...]
    h = _leaky_relu(h, NEG_SLOPE)
    # Dropout(0.35): identity in eval mode.

    # ---- Layer 3: Linear(32, 2), emitted transposed so the store is lane-dense ----
    #   out_t[2, bm] = w3t[2, 32] @ h.T[32, bm]
    out_t = jnp.dot(w3t_ref[...], h.T, preferred_element_type=jnp.float32) + b3t_ref[...]
    out_ref[...] = out_t.astype(out_ref.dtype)


def fold_bn_into_linear(params):
    """Fold eval-mode BatchNorm into the preceding Linear (exact, f32)."""
    scale1 = params["g1"] / jnp.sqrt(params["v1"] + BN_EPS)           # [1, 64]
    w1 = params["w1"] * scale1                                        # [F, 64]
    b1 = (params["b1"] - params["m1"]) * scale1 + params["beta1"]     # [1, 64]

    scale2 = params["g2"] / jnp.sqrt(params["v2"] + BN_EPS)           # [1, 32]
    w2 = params["w2"] * scale2                                        # [64, 32]
    b2 = (params["b2"] - params["m2"]) * scale2 + params["beta2"]     # [1, 32]

    w3t = params["w3"].T                                              # [2, 32]
    b3t = params["b3"].T                                              # [2, 1]
    return tuple(a.astype(jnp.float32) for a in (w1, b1, w2, b2, w3t, b3t))


def _choose_bm(B, bm_max):
    # Lane/MXU-aligned batch tile (multiple of 256, >= 256).  Clamp so batches
    # larger than one tile still produce >= 2 grid steps, which lets the
    # "parallel" axis shard across both v7x TensorCores.
    bm = min(bm_max, _round_up(max((B + 1) // 2, 1), 256))
    return max(bm, 256)


@functools.partial(jax.jit, static_argnames=("bm",))
def mlp_forward(x, folded, *, bm=4096):
    """x: [B, F] float32.  folded: output of fold_bn_into_linear(params)."""
    B, F = x.shape
    w1, b1, w2, b2, w3t, b3t = folded

    bm = _choose_bm(B, bm)
    grid = (pl.cdiv(B, bm),)

    full = lambda a: pl.BlockSpec(a.shape, lambda i: (0, 0))
    in_specs = [
        pl.BlockSpec((bm, F), lambda i: (i, 0)),     # x, tiled over batch
        full(w1), full(b1),
        full(w2), full(b2),
        full(w3t), full(b3t),
    ]
    # Output is produced transposed (2, B); the (2, bm) block is lane-dense.
    out_specs = pl.BlockSpec((2, bm), lambda i: (0, i))

    out_t = pl.pallas_call(
        mlp_kernel,
        out_shape=jax.ShapeDtypeStruct((2, B), jnp.float32),
        grid_spec=pltpu.PrefetchScalarGridSpec(
            num_scalar_prefetch=0,
            grid=grid,
            in_specs=in_specs,
            out_specs=out_specs,
        ),
        compiler_params=pltpu.CompilerParams(
            dimension_semantics=("parallel",),
            vmem_limit_bytes=32 * 1024 * 1024,       # headroom vs v5e's 16 MiB default
        ),
    )(x, w1, b1, w2, b2, w3t, b3t)

    return out_t.T                                    # [B, 2]


def init_params(key, input_size):
    """Deterministic synthetic parameters. Linear weights stored as [in, out]."""
    ks = jax.random.split(key, 9)

    def linear(kw, kb, fan_in, fan_out):
        bound = 1.0 / jnp.sqrt(fan_in)
        w = jax.random.uniform(kw, (fan_in, fan_out), jnp.float32, -bound, bound)
        b = jax.random.uniform(kb, (1, fan_out), jnp.float32, -bound, bound)
        return w, b

    w1, b1 = linear(ks[0], ks[1], input_size, 64)
    w2, b2 = linear(ks[2], ks[3], 64, 32)
    w3, b3 = linear(ks[4], ks[5], 32, 2)

    def bn(kg, kv, n):
        g = 1.0 + 0.1 * jax.random.normal(kg, (1, n), jnp.float32)
        beta = 0.05 * jax.random.normal(kv, (1, n), jnp.float32)
        m = 0.1 * jax.random.normal(jax.random.fold_in(kg, 1), (1, n), jnp.float32)
        v = 1.0 + 0.1 * jax.random.uniform(jax.random.fold_in(kv, 1), (1, n), jnp.float32)
        return g, beta, m, v

    g1, beta1, m1, v1 = bn(ks[6], ks[7], 64)
    g2, beta2, m2, v2 = bn(jax.random.fold_in(ks[8], 0), jax.random.fold_in(ks[8], 1), 32)

    return dict(
        w1=w1, b1=b1, g1=g1, beta1=beta1, m1=m1, v1=v1,
        w2=w2, b2=b2, g2=g2, beta2=beta2, m2=m2, v2=v2,
        w3=w3, b3=b3,
    )


def mlp_reference(x, p):
    """Pure-JAX f32 reference of the PyTorch forward (eval mode)."""
    h = x @ p["w1"] + p["b1"]
    h = (h - p["m1"]) * (p["g1"] / jnp.sqrt(p["v1"] + BN_EPS)) + p["beta1"]
    h = jnp.where(h >= 0, h, NEG_SLOPE * h)
    h = h @ p["w2"] + p["b2"]
    h = (h - p["m2"]) * (p["g2"] / jnp.sqrt(p["v2"] + BN_EPS)) + p["beta2"]
    h = jnp.where(h >= 0, h, NEG_SLOPE * h)
    return h @ p["w3"] + p["b3"]


if __name__ == "__main__":
    key = jax.random.PRNGKey(0)
    k_x, k_p = jax.random.split(key)

    input_size = 16
    batch = 8
    x = jax.random.normal(k_x, (batch, input_size), dtype=jnp.float32)
    params = init_params(k_p, input_size)

    # BN folding hoisted out of the forward: computed once, reused across calls.
    folded = fold_bn_into_linear(params)

    out = mlp_forward(x, folded)
    out = jax.block_until_ready(out)

    ref = mlp_reference(x, params)
    assert out.shape == (batch, 2), out.shape
    # All-f32 kernel: tolerance tightened vs the previous bf16 version.
    assert jnp.allclose(out, ref, atol=5e-3, rtol=5e-3), (
        float(jnp.max(jnp.abs(out - ref)))
    )
    print("KERNEL_OK")
</pallas_src>

<mosaic_0001>
module attributes {stable_mosaic.version = 11 : i64} {
  func.func @mlp_kernel(%arg0: i32, %arg1: memref<256x16xf32, #tpu.memory_space<vmem>>, %arg2: memref<16x64xf32, #tpu.memory_space<vmem>>, %arg3: memref<1x64xf32, #tpu.memory_space<vmem>>, %arg4: memref<64x32xf32, #tpu.memory_space<vmem>>, %arg5: memref<1x32xf32, #tpu.memory_space<vmem>>, %arg6: memref<2x32xf32, #tpu.memory_space<vmem>>, %arg7: memref<2x1xf32, #tpu.memory_space<vmem>>, %arg8: memref<2x256xf32, #tpu.memory_space<vmem>>) attributes {dimension_semantics = [#tpu.dimension_semantics<parallel>], iteration_bounds = array<i64: 1>, scalar_prefetch = 0 : i64, scratch_operands = 0 : i64, tpu.core_type = #tpu.core_type<tc>, window_params = [{transform_indices = @transform_0, window_bounds = array<i64: 256, 16>}, {pipeline_mode = #tpu.pipeline_mode<synchronous>, transform_indices = @transform_1, window_bounds = array<i64: 16, 64>}, {pipeline_mode = #tpu.pipeline_mode<synchronous>, transform_indices = @transform_2, window_bounds = array<i64: 1, 64>}, {pipeline_mode = #tpu.pipeline_mode<synchronous>, transform_indices = @transform_3, window_bounds = array<i64: 64, 32>}, {pipeline_mode = #tpu.pipeline_mode<synchronous>, transform_indices = @transform_4, window_bounds = array<i64: 1, 32>}, {pipeline_mode = #tpu.pipeline_mode<synchronous>, transform_indices = @transform_5, window_bounds = array<i64: 2, 32>}, {pipeline_mode = #tpu.pipeline_mode<synchronous>, transform_indices = @transform_6, window_bounds = array<i64: 2, 1>}, {transform_indices = @transform_7, window_bounds = array<i64: 2, 256>}]} {
    %c0 = arith.constant 0 : index
    %c0_0 = arith.constant 0 : index
    %0 = vector.load %arg1[%c0, %c0_0] : memref<256x16xf32, #tpu.memory_space<vmem>>, vector<256x16xf32>
    %c0_1 = arith.constant 0 : index
    %c0_2 = arith.constant 0 : index
    %1 = vector.load %arg2[%c0_1, %c0_2] : memref<16x64xf32, #tpu.memory_space<vmem>>, vector<16x64xf32>
    %cst = arith.constant dense<0.000000e+00> : vector<256x64xf32>
    %2 = tpu.matmul %0, %1, %cst {dimension_numbers = #tpu.dot_dimension_numbers<[1], [0], [0], [1], [0, 0, 1, 1], [], []>} : vector<256x16xf32>, vector<16x64xf32>, vector<256x64xf32> -> vector<256x64xf32>
    %c0_3 = arith.constant 0 : index
    %c0_4 = arith.constant 0 : index
    %3 = vector.load %arg3[%c0_3, %c0_4] : memref<1x64xf32, #tpu.memory_space<vmem>>, vector<1x64xf32>
    %4 = vector.broadcast %3 : vector<1x64xf32> to vector<256x64xf32>
    %5 = arith.addf %2, %4 : vector<256x64xf32>
    %cst_5 = arith.constant 0.000000e+00 : f32
    %6 = vector.broadcast %cst_5 : f32 to vector<256x64xf32>
    %7 = arith.cmpf oge, %5, %6 : vector<256x64xf32>
    %cst_6 = arith.constant 1.000000e-01 : f32
    %8 = vector.broadcast %cst_6 : f32 to vector<256x64xf32>
    %9 = arith.mulf %8, %5 : vector<256x64xf32>
    %10 = arith.select %7, %5, %9 : vector<256x64xi1>, vector<256x64xf32>
    %c0_7 = arith.constant 0 : index
    %c0_8 = arith.constant 0 : index
    %11 = vector.load %arg4[%c0_7, %c0_8] : memref<64x32xf32, #tpu.memory_space<vmem>>, vector<64x32xf32>
    %cst_9 = arith.constant dense<0.000000e+00> : vector<256x32xf32>
    %12 = tpu.matmul %10, %11, %cst_9 {dimension_numbers = #tpu.dot_dimension_numbers<[1], [0], [0], [1], [0, 0, 1, 1], [], []>} : vector<256x64xf32>, vector<64x32xf32>, vector<256x32xf32> -> vector<256x32xf32>
    %c0_10 = arith.constant 0 : index
    %c0_11 = arith.constant 0 : index
    %13 = vector.load %arg5[%c0_10, %c0_11] : memref<1x32xf32, #tpu.memory_space<vmem>>, vector<1x32xf32>
    %14 = vector.broadcast %13 : vector<1x32xf32> to vector<256x32xf32>
    %15 = arith.addf %12, %14 : vector<256x32xf32>
    %cst_12 = arith.constant 0.000000e+00 : f32
    %16 = vector.broadcast %cst_12 : f32 to vector<256x32xf32>
    %17 = arith.cmpf oge, %15, %16 : vector<256x32xf32>
    %cst_13 = arith.constant 1.000000e-01 : f32
    %18 = vector.broadcast %cst_13 : f32 to vector<256x32xf32>
    %19 = arith.mulf %18, %15 : vector<256x32xf32>
    %20 = arith.select %17, %15, %19 : vector<256x32xi1>, vector<256x32xf32>
    %c0_14 = arith.constant 0 : index
    %c0_15 = arith.constant 0 : index
    %21 = vector.load %arg6[%c0_14, %c0_15] : memref<2x32xf32, #tpu.memory_space<vmem>>, vector<2x32xf32>
    %22 = tpu.transpose %20, [1, 0] : vector<256x32xf32> -> vector<32x256xf32>
    %cst_16 = arith.constant dense<0.000000e+00> : vector<2x256xf32>
    %23 = tpu.matmul %21, %22, %cst_16 {dimension_numbers = #tpu.dot_dimension_numbers<[1], [0], [0], [1], [0, 0, 1, 1], [], []>} : vector<2x32xf32>, vector<32x256xf32>, vector<2x256xf32> -> vector<2x256xf32>
    %c0_17 = arith.constant 0 : index
    %c0_18 = arith.constant 0 : index
    %24 = vector.load %arg7[%c0_17, %c0_18] : memref<2x1xf32, #tpu.memory_space<vmem>>, vector<2x1xf32>
    %25 = vector.broadcast %24 : vector<2x1xf32> to vector<2x256xf32>
    %26 = arith.addf %23, %25 : vector<2x256xf32>
    %c0_19 = arith.constant 0 : index
    %c0_20 = arith.constant 0 : index
    %27 = vector.load %arg8[%c0_19, %c0_20] : memref<2x256xf32, #tpu.memory_space<vmem>>, vector<2x256xf32>
    tpu.vector_store %arg8[%c0_19, %c0_20], %26 {strides = array<i32>} : memref<2x256xf32, #tpu.memory_space<vmem>>, vector<2x256xf32>,
    return
  }
  func.func @transform_0(%arg0: i32) -> (i32, i32) {
    %c0_i32 = arith.constant 0 : i32
    %c0_i32_0 = arith.constant 0 : i32
    return %arg0, %c0_i32 : i32, i32
  }
  func.func @transform_1(%arg0: i32) -> (i32, i32) {
    %c0_i32 = arith.constant 0 : i32
    %c0_i32_0 = arith.constant 0 : i32
    %c0_i32_1 = arith.constant 0 : i32
    return %c0_i32, %c0_i32_0 : i32, i32
  }
  func.func @transform_2(%arg0: i32) -> (i32, i32) {
    %c0_i32 = arith.constant 0 : i32
    %c0_i32_0 = arith.constant 0 : i32
    %c0_i32_1 = arith.constant 0 : i32
    return %c0_i32, %c0_i32_0 : i32, i32
  }
  func.func @transform_3(%arg0: i32) -> (i32, i32) {
    %c0_i32 = arith.constant 0 : i32
    %c0_i32_0 = arith.constant 0 : i32
    %c0_i32_1 = arith.constant 0 : i32
    return %c0_i32, %c0_i32_0 : i32, i32
  }
  func.func @transform_4(%arg0: i32) -> (i32, i32) {
    %c0_i32 = arith.constant 0 : i32
    %c0_i32_0 = arith.constant 0 : i32
    %c0_i32_1 = arith.constant 0 : i32
    return %c0_i32, %c0_i32_0 : i32, i32
  }
  func.func @transform_5(%arg0: i32) -> (i32, i32) {
    %c0_i32 = arith.constant 0 : i32
    %c0_i32_0 = arith.constant 0 : i32
    %c0_i32_1 = arith.constant 0 : i32
    return %c0_i32, %c0_i32_0 : i32, i32
  }
  func.func @transform_6(%arg0: i32) -> (i32, i32) {
    %c0_i32 = arith.constant 0 : i32
    %c0_i32_0 = arith.constant 0 : i32
    %c0_i32_1 = arith.constant 0 : i32
    return %c0_i32, %c0_i32_0 : i32, i32
  }
  func.func @transform_7(%arg0: i32) -> (i32, i32) {
    %c0_i32 = arith.constant 0 : i32
    %c0_i32_0 = arith.constant 0 : i32
    return %c0_i32, %arg0 : i32, i32
  }
}

</mosaic_0001>

<bundles_post_ra>
// kernel: mlp_forward.1
= control target key start
LH: loop header
LB: loop body
LE: loop exit
PB: predicated region body
PF: predicated region fallthrough
CT: control target
= control target key end

     0   :  { %12 = vsyncpa [#allocation3], 0  ;;  %vm68_vm0 = vcmask 130048   ;;  %vm501_vm1 = vcmask 523264   ;;  %s1885_s0 = inlined_call_operand.vmem [shape: f32[8,16], index: 0, kind: input, shape index: {}]   ;;  %s1886_s1 = inlined_call_operand.vmem [shape: f32[16,64], index: 1, kind: input, shape index: {}]   ;;  %s1887_s2 = inlined_call_operand.vmem [shape: f32[1,64], index: 2, kind: input, shape index: {}]   ;;  %s1888_s3 = inlined_call_operand.vmem [shape: f32[64,32], index: 3, kind: input, shape index: {}]   ;;  %s1889_s4 = inlined_call_operand.vmem [shape: f32[1,32], index: 4, kind: input, shape index: {}]   ;;  %s1890_s5 = inlined_call_operand.vmem [shape: f32[2,32], index: 5, kind: input, shape index: {}]   ;;  %s1891_s6 = inlined_call_operand.vmem [shape: f32[2,1], index: 6, kind: input, shape index: {}]   ;;  %s1892_s7 = inlined_call_operand.hbm [shape: f32[2,8], index: 7, kind: output, shape index: {}]  }
   0x1   :  { %v60_v0 = vld [vmem:[%s1886_s1 + $0x8] sm:$0xff]  ;;  %v59_v1 = vld [vmem:[%s1886_s1] sm:$0xff]  ;;  %v29_v4 = vld [vmem:[%s1885_s0 + $0x10] sm:$0xff] }
   0x2   :  { %1331 = vmatprep.subr.mxu0 %v60_v0  ;;  %v27_v2 = vld [vmem:[%s1885_s0] sm:$0xff]  ;;  %v28_v3 = vld [vmem:[%s1885_s0 + $0x8] sm:$0xff]  ;;  %v30_v5 = vld [vmem:[%s1885_s0 + $0x18] sm:$0xff] }
   0x3   :  { %1332 = vmatpush3.msra.mxu0 %v60_v0  ;;  %1335 = vmatprep.mubr.msk.f32.mxu0 %vm68_vm0, %v27_v2  ;;  %v31_v6 = vld [vmem:[%s1885_s0 + $0x20] sm:$0xff]  ;;  %v32_v7 = vld [vmem:[%s1885_s0 + $0x28] sm:$0xff]  ;;  %v33_v8 = vld [vmem:[%s1885_s0 + $0x30] sm:$0xff] }
   0x4   :  { %1333 = vmatprep.subr.mxu0 %v59_v1  ;;  %v493_v9 = vld [vmem:[%s1888_s3 + $0x38] sm:$0xff]  ;;  %v492_v10 = vld [vmem:[%s1888_s3 + $0x30] sm:$0xff]  ;;  %v491_v11 = vld [vmem:[%s1888_s3 + $0x28] sm:$0xff] }
   0x5   :  { %1334 = vmatpush3.msra.mxu0 %v59_v1  ;;  %1383 = vmatprep.subr.mxu1 %v493_v9  ;;  %v34_v12 = vld [vmem:[%s1885_s0 + $0x38] sm:$0xff]  ;;  %v35_v13 = vld [vmem:[%s1885_s0 + $0x40] sm:$0xff]  ;;  %v36_v15 = vld [vmem:[%s1885_s0 + $0x48] sm:$0xff] }
   0x6   :  { %1336 = vmatmul.mubr.msk.f32.vlgmr.msra.gmra.mxu0 %vm68_vm0, %v28_v3  ;;  %1384 = vmatpush3.msra.mxu1 %v493_v9  ;;  %v490_v14 = vld [vmem:[%s1888_s3 + $0x20] sm:$0xff]  ;;  %v37_v16 = vld [vmem:[%s1885_s0 + $0x50] sm:$0xff]  ;;  %v38_v17 = vld [vmem:[%s1885_s0 + $0x58] sm:$0xff] }
   0x7   :  { %1338 = vmatprep.mubr.msk.f32.mxu0 %vm68_vm0, %v29_v4  ;;  %1385 = vmatprep.subr.mxu1 %v492_v10  ;;  %v39_v18 = vld [vmem:[%s1885_s0 + $0x60] sm:$0xff]  ;;  %v40_v19 = vld [vmem:[%s1885_s0 + $0x68] sm:$0xff]  ;;  %v41_v20 = vld [vmem:[%s1885_s0 + $0x70] sm:$0xff] }
   0x8   :  { %1386 = vmatpush3.msra.mxu1 %v492_v10  ;;  %v42_v21 = vld [vmem:[%s1885_s0 + $0x78] sm:$0xff]  ;;  %v43_v22 = vld [vmem:[%s1885_s0 + $0x80] sm:$0xff]  ;;  %v44_v23 = vld [vmem:[%s1885_s0 + $0x88] sm:$0xff] }
   0x9   :  { %1387 = vmatprep.subr.mxu1 %v491_v11  ;;  %v45_v24 = vld [vmem:[%s1885_s0 + $0x90] sm:$0xff]  ;;  %v46_v25 = vld [vmem:[%s1885_s0 + $0x98] sm:$0xff]  ;;  %v47_v26 = vld [vmem:[%s1885_s0 + $0xa0] sm:$0xff] }
   0xa   :  { %1339 = vmatmul.mubr.msk.f32.gmra.mxu0 %vm68_vm0, %v30_v5  ;;  %1388 = vmatpush3.msra.mxu1 %v491_v11  ;;  %v48_v27 = vld [vmem:[%s1885_s0 + $0xa8] sm:$0xff]  ;;  %v49_v28 = vld [vmem:[%s1885_s0 + $0xb0] sm:$0xff]  ;;  %v50_v29 = vld [vmem:[%s1885_s0 + $0xb8] sm:$0xff] }
   0xb   :  { %1341 = vmatprep.mubr.msk.f32.mxu0 %vm68_vm0, %v31_v6  ;;  %1389 = vmatprep.subr.mxu1 %v490_v14  ;;  %v51_v30 = vld [vmem:[%s1885_s0 + $0xc0] sm:$0xff]  ;;  %v52_v31 = vld [vmem:[%s1885_s0 + $0xc8] sm:$0xff]  ;;  %v53_v32 = vld [vmem:[%s1885_s0 + $0xd0] sm:$0xff] }
   0xc   :  { %1390 = vmatpush3.msra.mxu1 %v490_v14  ;;  %v54_v33 = vld [vmem:[%s1885_s0 + $0xd8] sm:$0xff]  ;;  %v55_v34 = vld [vmem:[%s1885_s0 + $0xe0] sm:$0xff]  ;;  %v56_v35 = vld [vmem:[%s1885_s0 + $0xe8] sm:$0xff] }
   0xd   :  { %v57_v36 = vld [vmem:[%s1885_s0 + $0xf0] sm:$0xff]  ;;  %v58_v37 = vld [vmem:[%s1885_s0 + $0xf8] sm:$0xff]  ;;  %v487_v40 = vld [vmem:[%s1888_s3 + $0x8] sm:$0xff] }
   0xe   :  { %1342 = vmatmul.mubr.msk.f32.gmra.mxu0 %vm68_vm0, %v32_v7  ;;  %v489_v38 = vld [vmem:[%s1888_s3 + $0x18] sm:$0xff]  ;;  %v488_v39 = vld [vmem:[%s1888_s3 + $0x10] sm:$0xff]  ;;  %v486_v41 = vld [vmem:[%s1888_s3] sm:$0xff] }
   0xf   :  { %1344 = vmatprep.mubr.msk.f32.mxu0 %vm68_vm0, %v33_v8  ;;  %1391 = vmatprep.subr.mxu1 %v489_v38  ;;  %v1675_v42 = vld [vmem:[%s1887_s2] ss:$0 sm:$0xff] }
  0x10   :  { %1392 = vmatpush3.msra.mxu1 %v489_v38 }
  0x11   :  { %1393 = vmatprep.subr.mxu1 %v488_v39 }
  0x12   :  { %1345 = vmatmul.mubr.msk.f32.gmra.mxu0 %vm68_vm0, %v34_v12  ;;  %1394 = vmatpush3.msra.mxu1 %v488_v39 }
  0x13   :  { %1347 = vmatprep.mubr.msk.f32.mxu0 %vm68_vm0, %v35_v13  ;;  %1395 = vmatprep.subr.mxu1 %v487_v40 }
  0x14   :  { %1396 = vmatpush3.msra.mxu1 %v487_v40 }
  0x15   :  { %1397 = vmatprep.subr.mxu1 %v486_v41 }
  0x16   :  { %1348 = vmatmul.mubr.msk.f32.gmra.mxu0 %vm68_vm0, %v36_v15  ;;  %1398 = vmatpush3.msra.mxu1 %v486_v41 }
  0x17   :  { %1350 = vmatprep.mubr.msk.f32.mxu0 %vm68_vm0, %v37_v16 }
  0x1a   :  { %1351 = vmatmul.mubr.msk.f32.gmra.mxu0 %vm68_vm0, %v38_v17 }
  0x1b   :  { %1353 = vmatprep.mubr.msk.f32.mxu0 %vm68_vm0, %v39_v18 }
  0x1e   :  { %1354 = vmatmul.mubr.msk.f32.gmra.mxu0 %vm68_vm0, %v40_v19 }
  0x1f   :  { %1356 = vmatprep.mubr.msk.f32.mxu0 %vm68_vm0, %v41_v20 }
  0x22   :  { %1357 = vmatmul.mubr.msk.f32.gmra.mxu0 %vm68_vm0, %v42_v21 }
  0x23   :  { %1359 = vmatprep.mubr.msk.f32.mxu0 %vm68_vm0, %v43_v22 }
  0x26   :  { %1360 = vmatmul.mubr.msk.f32.gmra.mxu0 %vm68_vm0, %v44_v23 }
  0x27   :  { %1362 = vmatprep.mubr.msk.f32.mxu0 %vm68_vm0, %v45_v24 }
  0x2a   :  { %1363 = vmatmul.mubr.msk.f32.gmra.mxu0 %vm68_vm0, %v46_v25 }
  0x2b   :  { %1365 = vmatprep.mubr.msk.f32.mxu0 %vm68_vm0, %v47_v26 }
  0x2e   :  { %1366 = vmatmul.mubr.msk.f32.gmra.mxu0 %vm68_vm0, %v48_v27 }
  0x2f   :  { %1368 = vmatprep.mubr.msk.f32.mxu0 %vm68_vm0, %v49_v28 }
  0x32   :  { %1369 = vmatmul.mubr.msk.f32.gmra.mxu0 %vm68_vm0, %v50_v29 }
  0x33   :  { %1371 = vmatprep.mubr.msk.f32.mxu0 %vm68_vm0, %v51_v30 }
  0x36   :  { %1372 = vmatmul.mubr.msk.f32.gmra.mxu0 %vm68_vm0, %v52_v31 }
  0x37   :  { %1374 = vmatprep.mubr.msk.f32.mxu0 %vm68_vm0, %v53_v32 }
  0x3a   :  { %1375 = vmatmul.mubr.msk.f32.gmra.mxu0 %vm68_vm0, %v54_v33 }
  0x3b   :  { %1377 = vmatprep.mubr.msk.f32.mxu0 %vm68_vm0, %v55_v34 }
  0x3e   :  { %1378 = vmatmul.mubr.msk.f32.gmra.mxu0 %vm68_vm0, %v56_v35 }
  0x3f   :  { %1380 = vmatprep.mubr.msk.f32.mxu0 %vm68_vm0, %v57_v36 }
  0x42   :  { %1381 = vmatmul.mubr.msk.f32.gmra.mxu0 %vm68_vm0, %v58_v37 }
  0xc6   :  { %v1337_v43 = vpop.f32.mrf.mxu0 }
  0xc7   :  { %v237_v44 = vadd.f32 %v1337_v43, %v1675_v42 }
  0xc8   :  { %v231_v45 = vpop.f32.mrf.mxu0 }
  0xc9   :  { %v232_v46 = vadd.f32 %v1675_v42, %v231_v45  ;;  %v423_v47 = vmul.f32 0.1, %v237_v44  ;;  %vm391_vm2 = vcmp.ge.f32.partialorder %v237_v44, 0.0 }
  0xca   :  { %v1340_v48 = vpop.f32.mrf.mxu0 }
  0xcb   :  { %v247_v49 = vadd.f32 %v1340_v48, %v1675_v42  ;;  %vm390_vm3 = vcmp.ge.f32.partialorder %v232_v46, 0.0  ;;  %v422_v50 = vmul.f32 0.1, %v232_v46  ;;  %v455_v56 = vsel %vm391_vm2, %v237_v44, %v423_v47 }
  0xcc   :  { %v241_v51 = vpop.f32.mrf.mxu0 }
  0xcd   :  { %v242_v52 = vadd.f32 %v1675_v42, %v241_v51  ;;  %v454_v53 = vsel %vm390_vm3, %v232_v46, %v422_v50  ;;  %v425_v54 = vmul.f32 0.1, %v247_v49  ;;  %vm393_vm4 = vcmp.ge.f32.partialorder %v247_v49, 0.0 }
  0xce   :  { %v1343_v55 = vpop.f32.mrf.mxu0  ;;  %1399 = vmatprep.mubr.msk.f32.mxu1 %vm501_vm1, %v454_v53 }
  0xcf   :  { %vm392_vm5 = vcmp.ge.f32.partialorder %v242_v52, 0.0  ;;  %v424_v57 = vmul.f32 0.1, %v242_v52  ;;  %v257_v58 = vadd.f32 %v1343_v55, %v1675_v42  ;;  %1400 = vmatmul.mubr.msk.f32.vlgmr.msra.gmra.mxu1 %vm501_vm1, %v455_v56  ;;  %v457_v0 = vsel %vm393_vm4, %v247_v49, %v425_v54 }
  0xd0   :  { %v251_v59 = vpop.f32.mrf.mxu0 }
  0xd1   :  { %v252_v60 = vadd.f32 %v1675_v42, %v251_v59  ;;  %v456_v61 = vsel %vm392_vm5, %v242_v52, %v424_v57  ;;  %v427_v62 = vmul.f32 0.1, %v257_v58  ;;  %vm395_vm6 = vcmp.ge.f32.partialorder %v257_v58, 0.0 }
  0xd2   :  { %v1346_v63 = vpop.f32.mrf.mxu0  ;;  %1402 = vmatprep.mubr.msk.f32.mxu1 %vm501_vm1, %v456_v61 }
  0xd3   :  { %vm394_vm7 = vcmp.ge.f32.partialorder %v252_v60, 0.0  ;;  %v426_v1 = vmul.f32 0.1, %v252_v60  ;;  %v267_v2 = vadd.f32 %v1346_v63, %v1675_v42  ;;  %1403 = vmatmul.mubr.msk.f32.gmra.mxu1 %vm501_vm1, %v457_v0  ;;  %v459_v8 = vsel %vm395_vm6, %v257_v58, %v427_v62 }
  0xd4   :  { %v261_v3 = vpop.f32.mrf.mxu0 }
  0xd5   :  { %v262_v4 = vadd.f32 %v1675_v42, %v261_v3  ;;  %v458_v5 = vsel %vm394_vm7, %v252_v60, %v426_v1  ;;  %v429_v6 = vmul.f32 0.1, %v267_v2  ;;  %vm397_vm8 = vcmp.ge.f32.partialorder %v267_v2, 0.0 }
  0xd6   :  { %v1349_v7 = vpop.f32.mrf.mxu0  ;;  %1405 = vmatprep.mubr.msk.f32.mxu1 %vm501_vm1, %v458_v5 }
  0xd7   :  { %vm396_vm9 = vcmp.ge.f32.partialorder %v262_v4, 0.0  ;;  %v428_v9 = vmul.f32 0.1, %v262_v4  ;;  %v277_v10 = vadd.f32 %v1349_v7, %v1675_v42  ;;  %1406 = vmatmul.mubr.msk.f32.gmra.mxu1 %vm501_vm1, %v459_v8  ;;  %v461_v16 = vsel %vm397_vm8, %v267_v2, %v429_v6 }
  0xd8   :  { %v271_v11 = vpop.f32.mrf.mxu0 }
  0xd9   :  { %v272_v12 = vadd.f32 %v1675_v42, %v271_v11  ;;  %v460_v13 = vsel %vm396_vm9, %v262_v4, %v428_v9  ;;  %v431_v14 = vmul.f32 0.1, %v277_v10  ;;  %vm399_vm10 = vcmp.ge.f32.partialorder %v277_v10, 0.0 }
  0xda   :  { %v1352_v15 = vpop.f32.mrf.mxu0  ;;  %1408 = vmatprep.mubr.msk.f32.mxu1 %vm501_vm1, %v460_v13 }
  0xdb   :  { %vm398_vm11 = vcmp.ge.f32.partialorder %v272_v12, 0.0  ;;  %v430_v17 = vmul.f32 0.1, %v272_v12  ;;  %v287_v18 = vadd.f32 %v1352_v15, %v1675_v42  ;;  %1409 = vmatmul.mubr.msk.f32.gmra.mxu1 %vm501_vm1, %v461_v16  ;;  %v463_v24 = vsel %vm399_vm10, %v277_v10, %v431_v14 }
  0xdc   :  { %v281_v19 = vpop.f32.mrf.mxu0 }
  0xdd   :  { %v282_v20 = vadd.f32 %v1675_v42, %v281_v19  ;;  %v462_v21 = vsel %vm398_vm11, %v272_v12, %v430_v17  ;;  %v433_v22 = vmul.f32 0.1, %v287_v18  ;;  %vm401_vm12 = vcmp.ge.f32.partialorder %v287_v18, 0.0 }
  0xde   :  { %v1355_v23 = vpop.f32.mrf.mxu0  ;;  %1411 = vmatprep.mubr.msk.f32.mxu1 %vm501_vm1, %v462_v21 }
  0xdf   :  { %vm400_vm13 = vcmp.ge.f32.partialorder %v282_v20, 0.0  ;;  %v432_v25 = vmul.f32 0.1, %v282_v20  ;;  %v297_v26 = vadd.f32 %v1355_v23, %v1675_v42  ;;  %1412 = vmatmul.mubr.msk.f32.gmra.mxu1 %vm501_vm1, %v463_v24  ;;  %v465_v32 = vsel %vm401_vm12, %v287_v18, %v433_v22 }
  0xe0   :  { %v291_v27 = vpop.f32.mrf.mxu0 }
  0xe1   :  { %v292_v28 = vadd.f32 %v1675_v42, %v291_v27  ;;  %v464_v29 = vsel %vm400_vm13, %v282_v20, %v432_v25  ;;  %v435_v30 = vmul.f32 0.1, %v297_v26  ;;  %vm403_vm14 = vcmp.ge.f32.partialorder %v297_v26, 0.0 }
  0xe2   :  { %v1358_v31 = vpop.f32.mrf.mxu0  ;;  %1414 = vmatprep.mubr.msk.f32.mxu1 %vm501_vm1, %v464_v29 }
  0xe3   :  { %vm402_vm15 = vcmp.ge.f32.partialorder %v292_v28, 0.0  ;;  %v434_v33 = vmul.f32 0.1, %v292_v28  ;;  %v307_v34 = vadd.f32 %v1358_v31, %v1675_v42  ;;  %1415 = vmatmul.mubr.msk.f32.gmra.mxu1 %vm501_vm1, %v465_v32  ;;  %v467_v40 = vsel %vm403_vm14, %v297_v26, %v435_v30 }
  0xe4   :  { %v301_v35 = vpop.f32.mrf.mxu0 }
  0xe5   :  { %v302_v36 = vadd.f32 %v1675_v42, %v301_v35  ;;  %v466_v37 = vsel %vm402_vm15, %v292_v28, %v434_v33  ;;  %v437_v38 = vmul.f32 0.1, %v307_v34  ;;  %vm405_vm0 = vcmp.ge.f32.partialorder %v307_v34, 0.0 }
  0xe6   :  { %v1361_v39 = vpop.f32.mrf.mxu0  ;;  %1417 = vmatprep.mubr.msk.f32.mxu1 %vm501_vm1, %v466_v37 }
  0xe7   :  { %vm404_vm2 = vcmp.ge.f32.partialorder %v302_v36, 0.0  ;;  %v436_v41 = vmul.f32 0.1, %v302_v36  ;;  %v317_v43 = vadd.f32 %v1361_v39, %v1675_v42  ;;  %1418 = vmatmul.mubr.msk.f32.gmra.mxu1 %vm501_vm1, %v467_v40  ;;  %v469_v49 = vsel %vm405_vm0, %v307_v34, %v437_v38 }
  0xe8   :  { %v311_v44 = vpop.f32.mrf.mxu0 }
  0xe9   :  { %v312_v45 = vadd.f32 %v1675_v42, %v311_v44  ;;  %v468_v46 = vsel %vm404_vm2, %v302_v36, %v436_v41  ;;  %v439_v47 = vmul.f32 0.1, %v317_v43  ;;  %vm407_vm3 = vcmp.ge.f32.partialorder %v317_v43, 0.0 }
  0xea   :  { %v1364_v48 = vpop.f32.mrf.mxu0  ;;  %1420 = vmatprep.mubr.msk.f32.mxu1 %vm501_vm1, %v468_v46 }
  0xeb   :  { %vm406_vm4 = vcmp.ge.f32.partialorder %v312_v45, 0.0  ;;  %v438_v50 = vmul.f32 0.1, %v312_v45  ;;  %v327_v51 = vadd.f32 %v1364_v48, %v1675_v42  ;;  %1421 = vmatmul.mubr.msk.f32.gmra.mxu1 %vm501_vm1, %v469_v49  ;;  %v471_v57 = vsel %vm407_vm3, %v317_v43, %v439_v47  ;;  %v920_v47 = vld [vmem:[%s1891_s6] sm:$0x3] }
  0xec   :  { %v321_v52 = vpop.f32.mrf.mxu0  ;;  %v1472_v48 = vmov 0  }
  0xed   :  { %v322_v53 = vadd.f32 %v1675_v42, %v321_v52  ;;  %v470_v54 = vsel %vm406_vm4, %v312_v45, %v438_v50  ;;  %v441_v55 = vmul.f32 0.1, %v327_v51  ;;  %vm409_vm5 = vcmp.ge.f32.partialorder %v327_v51, 0.0  ;;  %1449 = vset.pattern.permute.xlu0 %v1472_v48 }
  0xee   :  { %v1367_v56 = vpop.f32.mrf.mxu0  ;;  %1423 = vmatprep.mubr.msk.f32.mxu1 %vm501_vm1, %v470_v54  ;;  %vm926_vm4 = vcmask 261120   ;;  %923 = vperm.xlu0 %1449, %v920_v47  }
  0xef   :  { %vm408_vm6 = vcmp.ge.f32.partialorder %v322_v53, 0.0  ;;  %v440_v58 = vmul.f32 0.1, %v322_v53  ;;  %v337_v59 = vadd.f32 %v1367_v56, %v1675_v42  ;;  %1424 = vmatmul.mubr.msk.f32.gmra.mxu1 %vm501_vm1, %v471_v57  ;;  %v473_v1 = vsel %vm409_vm5, %v327_v51, %v441_v55 }
  0xf0   :  { %v331_v60 = vpop.f32.mrf.mxu0 }
  0xf1   :  { %v332_v61 = vadd.f32 %v1675_v42, %v331_v60  ;;  %v472_v62 = vsel %vm408_vm6, %v322_v53, %v440_v58  ;;  %v443_v63 = vmul.f32 0.1, %v337_v59  ;;  %vm411_vm7 = vcmp.ge.f32.partialorder %v337_v59, 0.0 }
  0xf2   :  { %v1370_v0 = vpop.f32.mrf.mxu0  ;;  %1426 = vmatprep.mubr.msk.f32.mxu1 %vm501_vm1, %v472_v62 }
  0xf3   :  { %vm410_vm8 = vcmp.ge.f32.partialorder %v332_v61, 0.0  ;;  %v442_v2 = vmul.f32 0.1, %v332_v61  ;;  %v347_v3 = vadd.f32 %v1370_v0, %v1675_v42  ;;  %1427 = vmatmul.mubr.msk.f32.gmra.mxu1 %vm501_vm1, %v473_v1  ;;  %v475_v9 = vsel %vm411_vm7, %v337_v59, %v443_v63 }
  0xf4   :  { %v341_v4 = vpop.f32.mrf.mxu0 }
  0xf5   :  { %v342_v5 = vadd.f32 %v1675_v42, %v341_v4  ;;  %v474_v6 = vsel %vm410_vm8, %v332_v61, %v442_v2  ;;  %v445_v7 = vmul.f32 0.1, %v347_v3  ;;  %vm413_vm9 = vcmp.ge.f32.partialorder %v347_v3, 0.0 }
  0xf6   :  { %v1373_v8 = vpop.f32.mrf.mxu0  ;;  %1429 = vmatprep.mubr.msk.f32.mxu1 %vm501_vm1, %v474_v6 }
  0xf7   :  { %vm412_vm10 = vcmp.ge.f32.partialorder %v342_v5, 0.0  ;;  %v444_v10 = vmul.f32 0.1, %v342_v5  ;;  %v357_v11 = vadd.f32 %v1373_v8, %v1675_v42  ;;  %1430 = vmatmul.mubr.msk.f32.gmra.mxu1 %vm501_vm1, %v475_v9  ;;  %v477_v17 = vsel %vm413_vm9, %v347_v3, %v445_v7 }
  0xf8   :  { %v351_v12 = vpop.f32.mrf.mxu0 }
  0xf9   :  { %v352_v13 = vadd.f32 %v1675_v42, %v351_v12  ;;  %v476_v14 = vsel %vm412_vm10, %v342_v5, %v444_v10  ;;  %v447_v15 = vmul.f32 0.1, %v357_v11  ;;  %vm415_vm11 = vcmp.ge.f32.partialorder %v357_v11, 0.0  ;;  %v1794_v12 = vld [vmem:[%s1889_s4] ss:$0 sm:$0xff] }
  0xfa   :  { %v1376_v16 = vpop.f32.mrf.mxu0  ;;  %1432 = vmatprep.mubr.msk.f32.mxu1 %vm501_vm1, %v476_v14 }
  0xfb   :  { %vm414_vm12 = vcmp.ge.f32.partialorder %v352_v13, 0.0  ;;  %v446_v18 = vmul.f32 0.1, %v352_v13  ;;  %v367_v19 = vadd.f32 %v1376_v16, %v1675_v42  ;;  %1433 = vmatmul.mubr.msk.f32.gmra.mxu1 %vm501_vm1, %v477_v17  ;;  %v479_v25 = vsel %vm415_vm11, %v357_v11, %v447_v15 }
  0xfc   :  { %v361_v20 = vpop.f32.mrf.mxu0 }
  0xfd   :  { %v362_v21 = vadd.f32 %v1675_v42, %v361_v20  ;;  %v478_v22 = vsel %vm414_vm12, %v352_v13, %v446_v18  ;;  %v449_v23 = vmul.f32 0.1, %v367_v19  ;;  %vm417_vm13 = vcmp.ge.f32.partialorder %v367_v19, 0.0 }
  0xfe   :  { %v1379_v24 = vpop.f32.mrf.mxu0  ;;  %1435 = vmatprep.mubr.msk.f32.mxu1 %vm501_vm1, %v478_v22 }
  0xff   :  { %vm416_vm14 = vcmp.ge.f32.partialorder %v362_v21, 0.0  ;;  %v448_v26 = vmul.f32 0.1, %v362_v21  ;;  %v377_v27 = vadd.f32 %v1379_v24, %v1675_v42  ;;  %1436 = vmatmul.mubr.msk.f32.gmra.mxu1 %vm501_vm1, %v479_v25  ;;  %v481_v33 = vsel %vm417_vm13, %v367_v19, %v449_v23 }
 0x100   :  { %v371_v28 = vpop.f32.mrf.mxu0 }
 0x101   :  { %v372_v29 = vadd.f32 %v1675_v42, %v371_v28  ;;  %v480_v30 = vsel %vm416_vm14, %v362_v21, %v448_v26  ;;  %v451_v31 = vmul.f32 0.1, %v377_v27  ;;  %vm419_vm15 = vcmp.ge.f32.partialorder %v377_v27, 0.0 }
 0x102   :  { %v1382_v32 = vpop.f32.mrf.mxu0  ;;  %1438 = vmatprep.mubr.msk.f32.mxu1 %vm501_vm1, %v480_v30 }
 0x103   :  { %vm418_vm0 = vcmp.ge.f32.partialorder %v372_v29, 0.0  ;;  %v450_v34 = vmul.f32 0.1, %v372_v29  ;;  %v387_v35 = vadd.f32 %v1382_v32, %v1675_v42  ;;  %1439 = vmatmul.mubr.msk.f32.gmra.mxu1 %vm501_vm1, %v481_v33  ;;  %v483_v40 = vsel %vm419_vm15, %v377_v27, %v451_v31 }
 0x104   :  { %v381_v36 = vpop.f32.mrf.mxu0 }
 0x105   :  { %v382_v37 = vadd.f32 %v1675_v42, %v381_v36  ;;  %v482_v38 = vsel %vm418_vm0, %v372_v29, %v450_v34  ;;  %v453_v39 = vmul.f32 0.1, %v387_v35  ;;  %vm421_vm2 = vcmp.ge.f32.partialorder %v387_v35, 0.0  ;;  %v1744_v42 = vld [vmem:[%s1890_s5] sm:$0x3] }
 0x106   :  { %1441 = vmatprep.mubr.msk.f32.mxu1 %vm501_vm1, %v482_v38  ;;  %1329 = vmatprep.mubr.msk.f32.mxu0 %vm926_vm4, %v1744_v42 }
 0x107   :  { %vm420_vm3 = vcmp.ge.f32.partialorder %v382_v37, 0.0  ;;  %v452_v41 = vmul.f32 0.1, %v382_v37  ;;  %1442 = vmatmul.mubr.msk.f32.gmra.mxu1 %vm501_vm1, %v483_v40  ;;  %v485_v44 = vsel %vm421_vm2, %v387_v35, %v453_v39 }
 0x109   :  { %v484_v43 = vsel %vm420_vm3, %v382_v37, %v452_v41 }
 0x10a   :  { %1444 = vmatprep.mubr.msk.f32.mxu1 %vm501_vm1, %v484_v43 }
 0x10b   :  { %1445 = vmatmul.mubr.msk.f32.gmra.mxu1 %vm501_vm1, %v485_v44 }
 0x18f   :  { %v1746_v45 = vpop.f32.mrf.mxu1 }
 0x191   :  { %v1750_v46 = vpop.f32.mrf.mxu1 }
 0x193   :  { %v1755_v49 = vpop.f32.mrf.mxu1 }
 0x195   :  { %v1757_v50 = vpop.f32.mrf.mxu1 }
 0x197   :  { %v1759_v51 = vpop.f32.mrf.mxu1 }
 0x199   :  { %v1761_v52 = vpop.f32.mrf.mxu1 }
 0x19b   :  { %v1763_v53 = vpop.f32.mrf.mxu1 }
 0x19d   :  { %v1765_v54 = vpop.f32.mrf.mxu1 }
 0x19f   :  { %v1767_v55 = vpop.f32.mrf.mxu1 }
 0x1a1   :  { %v1769_v56 = vpop.f32.mrf.mxu1 }
 0x1a3   :  { %v1416_v57 = vpop.f32.mrf.mxu1 }
 0x1a4   :  { %v720_v37 = vadd.f32 %v1416_v57, %v1794_v12 }
 0x1a5   :  { %v1771_v58 = vpop.f32.mrf.mxu1 }
 0x1a6   :  { %v866_v44 = vmul.f32 0.1, %v720_v37  ;;  %v715_v47 = vadd.f32 %v1794_v12, %v1771_v58  ;;  %vm834_vm13 = vcmp.ge.f32.partialorder %v720_v37, 0.0 }
 0x1a7   :  { %v1419_v59 = vpop.f32.mrf.mxu1 }
 0x1a8   :  { %v730_v25 = vadd.f32 %v1419_v59, %v1794_v12  ;;  %vm833_vm15 = vcmp.ge.f32.partialorder %v715_v47, 0.0 }
 0x1a9   :  { %v724_v60 = vpop.f32.mrf.mxu1 }
 0x1aa   :  { %v868_v31 = vmul.f32 0.1, %v730_v25  ;;  %v725_v32 = vadd.f32 %v1794_v12, %v724_v60  ;;  %vm836_vm9 = vcmp.ge.f32.partialorder %v730_v25, 0.0 }
 0x1ab   :  { %v1422_v61 = vpop.f32.mrf.mxu1 }
 0x1ac   :  { %v740_v13 = vadd.f32 %v1422_v61, %v1794_v12  ;;  %v900_v38 = vsel %vm836_vm9, %v730_v25, %v868_v31  ;;  %v867_v39 = vmul.f32 0.1, %v725_v32  ;;  %vm835_vm11 = vcmp.ge.f32.partialorder %v725_v32, 0.0 }
 0x1ad   :  { %v734_v62 = vpop.f32.mrf.mxu1  ;;  %v710_v61 = vadd.f32 %v1767_v55, %v1794_v12 }
 0x1ae   :  { %vm838_vm1 = vcmp.ge.f32.partialorder %v740_v13, 0.0  ;;  %v870_v17 = vmul.f32 0.1, %v740_v13  ;;  %v735_v18 = vadd.f32 %v1794_v12, %v734_v62  ;;  %v899_v48 = vsel %vm835_vm11, %v725_v32, %v867_v39 }
 0x1af   :  { %v1773_v63 = vpop.f32.mrf.mxu1  ;;  %v898_v62 = vsel %vm834_vm13, %v720_v37, %v866_v44  ;;  %vm832_vm2 = vcmp.ge.f32.partialorder %v710_v61, 0.0  ;;  %v675_v37 = vadd.f32 %v1794_v12, %v1757_v50 }
 0x1b0   :  { %v902_v26 = vsel %vm838_vm1, %v740_v13, %v870_v17  ;;  %v869_v27 = vmul.f32 0.1, %v735_v18  ;;  %vm837_vm7 = vcmp.ge.f32.partialorder %v735_v18, 0.0  ;;  %v705_v13 = vadd.f32 %v1794_v12, %v1769_v56 }
 0x1b1   :  { %v1775_v0 = vpop.f32.mrf.mxu1 }
 0x1b2   :  { %v901_v33 = vsel %vm837_vm7, %v735_v18, %v869_v27  ;;  %v863_v18 = vmul.f32 0.1, %v705_v13  ;;  %vm831_vm1 = vcmp.ge.f32.partialorder %v705_v13, 0.0  ;;  %v745_v50 = vadd.f32 %v1794_v12, %v1775_v0 }
 0x1b3   :  { %v1777_v1 = vpop.f32.mrf.mxu1 }
 0x1b5   :  { %v1779_v2 = vpop.f32.mrf.mxu1 }
 0x1b7   :  { %v1781_v3 = vpop.f32.mrf.mxu1 }
 0x1b9   :  { %v1783_v4 = vpop.f32.mrf.mxu1 }
 0x1bb   :  { %v1785_v5 = vpop.f32.mrf.mxu1 }
 0x1bc   :  { %v780_v55 = vadd.f32 %v1785_v5, %v1794_v12 }
 0x1bd   :  { %v1787_v6 = vpop.f32.mrf.mxu1 }
 0x1be   :  { %v775_v56 = vadd.f32 %v1794_v12, %v1787_v6  ;;  %v690_v6 = vadd.f32 %v1759_v51, %v1794_v12  ;;  %v760_v51 = vadd.f32 %v1777_v1, %v1794_v12 }
 0x1bf   :  { %v1437_v7 = vpop.f32.mrf.mxu1 }
 0x1c0   :  { %v790_v57 = vadd.f32 %v1437_v7, %v1794_v12  ;;  %vm845_vm7 = vcmp.ge.f32.partialorder %v775_v56, 0.0  ;;  %vm842_vm13 = vcmp.ge.f32.partialorder %v760_v51, 0.0 }
 0x1c1   :  { %v1789_v8 = vpop.f32.mrf.mxu1 }
 0x1c2   :  { %v785_v58 = vadd.f32 %v1794_v12, %v1789_v8  ;;  %vm848_vm0 = vcmp.ge.f32.partialorder %v790_v57, 0.0  ;;  %v700_v8 = vadd.f32 %v1763_v53, %v1794_v12  ;;  %v770_v53 = vadd.f32 %v1781_v3, %v1794_v12 }
 0x1c3   :  { %v1440_v9 = vpop.f32.mrf.mxu1 }
 0x1c4   :  { %v800_v34 = vadd.f32 %v1440_v9, %v1794_v12  ;;  %v865_v9 = vmul.f32 0.1, %v715_v47  ;;  %vm847_vm3 = vcmp.ge.f32.partialorder %v785_v58, 0.0  ;;  %v876_v27 = vmul.f32 0.1, %v770_v53 }
 0x1c5   :  { %v794_v10 = vpop.f32.mrf.mxu1  ;;  %vm844_vm9 = vcmp.ge.f32.partialorder %v770_v53, 0.0 }
 0x1c6   :  { %v882_v40 = vmul.f32 0.1, %v800_v34  ;;  %v795_v41 = vadd.f32 %v1794_v12, %v794_v10  ;;  %vm850_vm12 = vcmp.ge.f32.partialorder %v800_v34, 0.0  ;;  %v880_v10 = vmul.f32 0.1, %v790_v57 }
 0x1c7   :  { %v1443_v11 = vpop.f32.mrf.mxu1  ;;  %v908_v32 = vsel %vm844_vm9, %v770_v53, %v876_v27 }
 0x1c8   :  { %v810_v20 = vadd.f32 %v1443_v11, %v1794_v12  ;;  %v881_v59 = vmul.f32 0.1, %v795_v41  ;;  %v914_v60 = vsel %vm850_vm12, %v800_v34, %v882_v40  ;;  %vm849_vm14 = vcmp.ge.f32.partialorder %v795_v41, 0.0 }
 0x1c9   :  { %v804_v14 = vpop.f32.mrf.mxu1  ;;  %v864_v11 = vmul.f32 0.1, %v710_v61 }
 0x1ca   :  { %v884_v28 = vmul.f32 0.1, %v810_v20  ;;  %v805_v29 = vadd.f32 %v1794_v12, %v804_v14  ;;  %vm852_vm8 = vcmp.ge.f32.partialorder %v810_v20, 0.0  ;;  %v913_v7 = vsel %vm849_vm14, %v795_v41, %v881_v59 }
 0x1cb   :  { %v1446_v15 = vpop.f32.mrf.mxu1  ;;  %v897_v14 = vsel %vm833_vm15, %v715_v47, %v865_v9  ;;  %v896_v17 = vsel %vm832_vm2, %v710_v61, %v864_v11 }
 0x1cc   :  { %v820_v16 = vadd.f32 %v1446_v15, %v1794_v12  ;;  %v883_v35 = vmul.f32 0.1, %v805_v29  ;;  %v916_v36 = vsel %vm852_vm8, %v810_v20, %v884_v28  ;;  %vm851_vm10 = vcmp.ge.f32.partialorder %v805_v29, 0.0 }
 0x1cd   :  { %v814_v19 = vpop.f32.mrf.mxu1  ;;  %v879_v15 = vmul.f32 0.1, %v785_v58  ;;  %v862_v20 = vmul.f32 0.1, %v700_v8  ;;  %v860_v28 = vmul.f32 0.1, %v690_v6 }
 0x1ce   :  { %vm854_vm5 = vcmp.ge.f32.partialorder %v820_v16, 0.0  ;;  %v886_v21 = vmul.f32 0.1, %v820_v16  ;;  %v815_v22 = vadd.f32 %v1794_v12, %v814_v19  ;;  %v915_v43 = vsel %vm851_vm10, %v805_v29, %v883_v35 }
 0x1cf   :  { %v878_v19 = vmul.f32 0.1, %v780_v55  ;;  %v911_v5 = vsel %vm847_vm3, %v785_v58, %v879_v15  ;;  %v685_v29 = vadd.f32 %v1794_v12, %v1761_v52  ;;  %vm828_vm10 = vcmp.ge.f32.partialorder %v690_v6, 0.0 }
 0x1d0   :  { %vm853_vm6 = vcmp.ge.f32.partialorder %v815_v22, 0.0  ;;  %v885_v23 = vmul.f32 0.1, %v815_v22  ;;  %v918_v24 = vsel %vm854_vm5, %v820_v16, %v886_v21  ;;  %v912_v16 = vsel %vm848_vm0, %v790_v57, %v880_v10 }
 0x1d1   :  { %1297 = vmatprep.subr.msk.mxu0 %vm926_vm4, %v918_v24  ;;  %vm846_vm5 = vcmp.ge.f32.partialorder %v780_v55, 0.0  ;;  %v695_v21 = vadd.f32 %v1794_v12, %v1765_v54  ;;  %v765_v54 = vadd.f32 %v1794_v12, %v1783_v4  ;;  %v680_v4 = vadd.f32 %v1755_v49, %v1794_v12 }
 0x1d2   :  { %1298 = vmatpush3.xpose.msk.msra.mxu0 %vm926_vm4, %v902_v26  ;;  %v917_v30 = vsel %vm853_vm6, %v815_v22, %v885_v23  ;;  %v895_v22 = vsel %vm831_vm1, %v705_v13, %v863_v18  ;;  %vm830_vm6 = vcmp.ge.f32.partialorder %v700_v8, 0.0  ;;  %v877_v23 = vmul.f32 0.1, %v775_v56 }
 0x1d3   :  { %1299 = vmatprep.subr.msk.mxu0 %vm926_vm4, %v917_v30  ;;  %v910_v24 = vsel %vm846_vm5, %v780_v55, %v878_v19  ;;  %v894_v25 = vsel %vm830_vm6, %v700_v8, %v862_v20  ;;  %v861_v26 = vmul.f32 0.1, %v695_v21  ;;  %vm829_vm8 = vcmp.ge.f32.partialorder %v695_v21, 0.0 }
 0x1d4   :  { %v909_v3 = vsel %vm845_vm7, %v775_v56, %v877_v23  ;;  %v875_v31 = vmul.f32 0.1, %v765_v54  ;;  %vm843_vm11 = vcmp.ge.f32.partialorder %v765_v54, 0.0  ;;  %v859_v34 = vmul.f32 0.1, %v685_v29 }
 0x1d5   :  { %v893_v30 = vsel %vm829_vm8, %v695_v21, %v861_v26  ;;  %vm827_vm12 = vcmp.ge.f32.partialorder %v685_v29, 0.0  ;;  %v874_v35 = vmul.f32 0.1, %v760_v51  ;;  %v755_v52 = vadd.f32 %v1794_v12, %v1779_v2 }
 0x1d6   :  { %1300 = vmatpush3.xpose.msk.msra.mxu0 %vm926_vm4, %v901_v33  ;;  %v892_v33 = vsel %vm828_vm10, %v690_v6, %v860_v28  ;;  %v907_v1 = vsel %vm843_vm11, %v765_v54, %v875_v31  ;;  %vm826_vm14 = vcmp.ge.f32.partialorder %v680_v4, 0.0  ;;  %v750_v49 = vadd.f32 %v1773_v63, %v1794_v12 }
 0x1d7   :  { %1301 = vmatprep.subr.msk.mxu0 %vm926_vm4, %v916_v36  ;;  %v858_v36 = vmul.f32 0.1, %v680_v4  ;;  %v873_v39 = vmul.f32 0.1, %v755_v52  ;;  %v906_v40 = vsel %vm842_vm13, %v760_v51, %v874_v35  ;;  %vm841_vm15 = vcmp.ge.f32.partialorder %v755_v52, 0.0 }
 0x1d8   :  { %v670_v2 = vadd.f32 %v1746_v45, %v1794_v12  ;;  %vm825_vm0 = vcmp.ge.f32.partialorder %v675_v37, 0.0  ;;  %v872_v44 = vmul.f32 0.1, %v750_v49  ;;  %vm840_vm2 = vcmp.ge.f32.partialorder %v750_v49, 0.0 }
 0x1d9   :  { %v890_v41 = vsel %vm826_vm14, %v680_v4, %v858_v36  ;;  %v905_v63 = vsel %vm841_vm15, %v755_v52, %v873_v39  ;;  %v871_v45 = vmul.f32 0.1, %v745_v50  ;;  %vm839_vm1 = vcmp.ge.f32.partialorder %v745_v50, 0.0 }
 0x1da   :  { %1302 = vmatpush3.xpose.msk.msra.mxu0 %vm926_vm4, %v900_v38  ;;  %v891_v38 = vsel %vm827_vm12, %v685_v29, %v859_v34  ;;  %v856_v47 = vmul.f32 0.1, %v670_v2  ;;  %vm824_vm3 = vcmp.ge.f32.partialorder %v670_v2, 0.0  ;;  %v904_v59 = vsel %vm840_vm2, %v750_v49, %v872_v44 }
 0x1db   :  { %1303 = vmatprep.subr.msk.mxu0 %vm926_vm4, %v915_v43  ;;  %v857_v43 = vmul.f32 0.1, %v675_v37  ;;  %v903_v61 = vsel %vm839_vm1, %v745_v50, %v871_v45 }
 0x1dc   :  { %v888_v0 = vsel %vm824_vm3, %v670_v2, %v856_v47 }
 0x1dd   :  { %v889_v57 = vsel %vm825_vm0, %v675_v37, %v857_v43 }
 0x1de   :  { %1304 = vmatpush3.xpose.msk.msra.mxu0 %vm926_vm4, %v899_v48  ;;  %v665_v48 = vadd.f32 %v1794_v12, %v1750_v46  ;;  %v924_v12 = vpop.permute.xlu0 %923 }
 0x1df   :  { %1305 = vmatprep.subr.msk.mxu0 %vm926_vm4, %v914_v60 }
 0x1e0   :  { %v855_v60 = vmul.f32 0.1, %v665_v48  ;;  %vm823_vm5 = vcmp.ge.f32.partialorder %v665_v48, 0.0 }
 0x1e2   :  { %1306 = vmatpush3.xpose.msk.msra.mxu0 %vm926_vm4, %v898_v62  ;;  %v887_v62 = vsel %vm823_vm5, %v665_v48, %v855_v60 }
 0x1e3   :  { %1307 = vmatprep.subr.msk.mxu0 %vm926_vm4, %v913_v7 }
 0x1e6   :  { %1308 = vmatpush3.xpose.msk.msra.mxu0 %vm926_vm4, %v897_v14 }
 0x1e7   :  { %1309 = vmatprep.subr.msk.mxu0 %vm926_vm4, %v912_v16 }
 0x1ea   :  { %1310 = vmatpush3.xpose.msk.msra.mxu0 %vm926_vm4, %v896_v17 }
 0x1eb   :  { %1311 = vmatprep.subr.msk.mxu0 %vm926_vm4, %v911_v5 }
 0x1ee   :  { %1312 = vmatpush3.xpose.msk.msra.mxu0 %vm926_vm4, %v895_v22 }
 0x1ef   :  { %1313 = vmatprep.subr.msk.mxu0 %vm926_vm4, %v910_v24 }
 0x1f2   :  { %1314 = vmatpush3.xpose.msk.msra.mxu0 %vm926_vm4, %v894_v25 }
 0x1f3   :  { %1315 = vmatprep.subr.msk.mxu0 %vm926_vm4, %v909_v3 }
 0x1f6   :  { %1316 = vmatpush3.xpose.msk.msra.mxu0 %vm926_vm4, %v893_v30 }
 0x1f7   :  { %1317 = vmatprep.subr.msk.mxu0 %vm926_vm4, %v908_v32 }
 0x1fa   :  { %1318 = vmatpush3.xpose.msk.msra.mxu0 %vm926_vm4, %v892_v33 }
 0x1fb   :  { %1319 = vmatprep.subr.msk.mxu0 %vm926_vm4, %v907_v1 }
 0x1fe   :  { %1320 = vmatpush3.xpose.msk.msra.mxu0 %vm926_vm4, %v891_v38 }
 0x1ff   :  { %1321 = vmatprep.subr.msk.mxu0 %vm926_vm4, %v906_v40 }
 0x202   :  { %1322 = vmatpush3.xpose.msk.msra.mxu0 %vm926_vm4, %v890_v41 }
 0x203   :  { %1323 = vmatprep.subr.msk.mxu0 %vm926_vm4, %v905_v63 }
 0x206   :  { %1324 = vmatpush3.xpose.msk.msra.mxu0 %vm926_vm4, %v889_v57 }
 0x207   :  { %1325 = vmatprep.subr.msk.mxu0 %vm926_vm4, %v904_v59 }
 0x20a   :  { %1326 = vmatpush3.xpose.msk.msra.mxu0 %vm926_vm4, %v888_v0 }
 0x20b   :  { %1327 = vmatprep.subr.msk.mxu0 %vm926_vm4, %v903_v61 }
 0x20e   :  { %1328 = vmatpush3.xpose.msk.msra.mxu0 %vm926_vm4, %v887_v62 }
 0x211   :  { %1330 = vmatmul.mubr.msk.f32.vlgmr.msra.gmra.mxu0 %vm926_vm4, %v1744_v42 }
 0x2d1   :  { %v1092_v46 = vpop.f32.mrf.mxu0 }
 0x2d2   :  { %v1093_v10 = vadd.f32 %v1092_v46, %v924_v12 }
 0x2d3   :  { %v1094_v9 = vpop.f32.mrf.mxu0 }
 0x2d4   :  { %v1095_v58 = vadd.f32 %v1094_v9, %v924_v12 }
 0x2d6   :  { %v1099_v7 = vcombine.low %v1093_v10, %v1095_v58 }
 0x2d8   :  { %1222 = vst.sshfl [vmem:[#allocation2] sm:$0x33 pattern:$0x76325410] %v1099_v7 }
 0x2d9   :  { %1113 = vsyncadd [#allocation3], 32  ;;  %s1473_s4 = smov [#allocation2]  }
 0x2da   :  { %s1115_s15 = sshll.u32 %s1473_s4, 4  ;;  %s1116_s15 = int_to_ptr.vmem [resolvable:$true] %s1115_s15 }
 0x2db   :  { %s1450_s16 = scalar_lea.vmem %s1116_s15, 32  ;;  %s1454_s17 = scalar_lea.vmem %s1116_s15, 64 }
 0x2dc   :  { %p1451_p0 = scmp.ne.s32.totalorder %s1116_s15, %s1450_s16  ;;  %p1455_p1 = scmp.lt.s32.totalorder %s1116_s15, %s1116_s15 }
 0x2dd   :  { %p1456_p2 = scmp.lt.s32.totalorder %s1454_s17, %s1450_s16 }
 0x2df   :  { %p1457_p3 = por %p1456_p2, %p1455_p1 }
 0x2e1   :  { %p1458_p4 = pnand %p1457_p3, %p1451_p0 }
 0x2e3   :  { %1461 = shalt.err (!%p1458_p4)
}
 0x2e4   :  { %1118 = dma.vmem_to_hbm [thread:$0]  %s1116_s15, 32, %s1892_s7, [#allocation3]  }
 0x2e5   :  { %1470 = dma.done.wait [#allocation3], 64  }
 0x2e6   :  { %1471 = vsyncadd [#allocation3], 4294967232 }
 0x2e7   :  { %1122 = vsyncpa [#allocation3], 1 }

</bundles_post_ra>
